<compile_context>
chip_gen: v6e
topology: v6e:2x2x1
jax: 0.10.0
libtpu: 0.0.40
codegen_flags: <defaults>
</compile_context>

<pallas_src>
import jax
import jax.numpy as jnp
from jax.experimental import pallas as pl
from jax.experimental.pallas import tpu as pltpu


def _round_up(x, m):
    return ((x + m - 1) // m) * m


def _conv_gemm_relu_kernel(w_ref, b_ref, p_ref, o_ref):
    # w_ref: (OC, K) bf16    b_ref: (OC, 1) f32
    # p_ref: (K, TOHW) bf16  o_ref: (OC, TOHW) f32   (batch dim squeezed by BlockSpec)
    acc = jnp.dot(w_ref[...], p_ref[...], preferred_element_type=jnp.float32)
    acc = acc + b_ref[...]                       # (OC, 1) broadcast over lanes
    o_ref[...] = jnp.maximum(acc, 0.0).astype(o_ref.dtype)


def squeeze_init_block(x, weight, bias, stride=2):
    """x: (N, C, H, W) f32; weight: (OC, C, KH, KW) f32; bias: (OC,) -> (N, OC, OH, OW) f32."""
    N, C, H, W = x.shape
    OC, _, KH, KW = weight.shape
    OH = (H - KH) // stride + 1
    OW = (W - KW) // stride + 1
    OHW = OH * OW
    Kdim = C * KH * KW

    # Lane-dense tile along the flattened output-spatial axis.
    TOHW = min(2048, _round_up(OHW, 128))
    OHW_pad = _round_up(OHW, TOHW)

    # --- fused im2col: (N, C*KH*KW, OH, OW); feature ordering (C, KH, KW) matches OIHW ---
    patches = jax.lax.conv_general_dilated_patches(
        x, filter_shape=(KH, KW), window_strides=(stride, stride), padding="VALID")
    patches = patches.reshape(N, Kdim, OHW).astype(jnp.bfloat16)
    if OHW_pad != OHW:
        patches = jnp.pad(patches, ((0, 0), (0, 0), (0, OHW_pad - OHW)))

    w_mat = weight.reshape(OC, Kdim).astype(jnp.bfloat16)   # (OC, K)
    b_mat = bias.reshape(OC, 1).astype(jnp.float32)         # (OC, 1)

    num_t = OHW_pad // TOHW
    grid = (N, num_t)

    cost = pl.CostEstimate(
        flops=2 * N * OHW_pad * Kdim * OC,
        transcendentals=0,
        bytes_accessed=(patches.size * 2 + w_mat.size * 2 + b_mat.size * 4
                        + N * OC * OHW_pad * 4),
    )

    out = pl.pallas_call(
        _conv_gemm_relu_kernel,
        out_shape=jax.ShapeDtypeStruct((N, OC, OHW_pad), jnp.float32),
        grid=grid,
        in_specs=[
            pl.BlockSpec((OC, Kdim), lambda n, t: (0, 0)),             # weight: resident
            pl.BlockSpec((OC, 1), lambda n, t: (0, 0)),                # bias: resident
            pl.BlockSpec((None, Kdim, TOHW), lambda n, t: (n, 0, t)),  # patch tile (pipelined)
        ],
        out_specs=pl.BlockSpec((None, OC, TOHW), lambda n, t: (n, 0, t)),
        compiler_params=pltpu.CompilerParams(
            dimension_semantics=("parallel", "parallel"),
            vmem_limit_bytes=32 * 1024 * 1024),
        cost_estimate=cost,
    )(w_mat, b_mat, patches)

    out = out[:, :, :OHW]                  # drop spatial padding columns
    return out.reshape(N, OC, OH, OW)      # already NCHW: no transpose needed


if __name__ == "__main__":
    key = jax.random.PRNGKey(0)
    kx, kw, kb = jax.random.split(key, 3)

    # Small shapes consistent with the module: N=2, in_channels=4, H=W=16,
    # out_channels=32, kernel_size=3, stride=2  ->  output (2, 32, 7, 7)
    N, C, H, W = 2, 4, 16, 16
    OC, K = 32, 3

    x = jax.random.normal(kx, (N, C, H, W), dtype=jnp.float32)
    # Deterministic synthetic parameter init (not a checkpoint load).
    fan_in = C * K * K
    bound = 1.0 / (fan_in ** 0.5)
    weight = jax.random.uniform(kw, (OC, C, K, K), jnp.float32, -bound, bound)
    bias = jax.random.uniform(kb, (OC,), jnp.float32, -bound, bound)

    y = squeeze_init_block(x, weight, bias, stride=2)
    y = jax.block_until_ready(y)

    # Reference: XLA conv + ReLU on bf16-rounded inputs (kernel matmul runs bf16 on the MXU,
    # accumulation / bias / ReLU in f32).
    x_bf = x.astype(jnp.bfloat16).astype(jnp.float32)
    w_bf = weight.astype(jnp.bfloat16).astype(jnp.float32)
    ref = jax.lax.conv_general_dilated(
        x_bf, w_bf, window_strides=(2, 2), padding="VALID",
        dimension_numbers=("NCHW", "OIHW", "NCHW"),
        preferred_element_type=jnp.float32)
    ref = jnp.maximum(ref + bias[None, :, None, None], 0.0)

    assert y.shape == (N, OC, 7, 7), y.shape
    assert jnp.allclose(y, ref, atol=1e-3, rtol=1e-3), float(jnp.max(jnp.abs(y - ref)))

    print("KERNEL_OK")
</pallas_src>

<mosaic_0001>
module attributes {stable_mosaic.version = 11 : i64} {
  func.func @_conv_gemm_relu_kernel(%arg0: i32, %arg1: i32, %arg2: memref<32x36xbf16, #tpu.memory_space<vmem>>, %arg3: memref<32x1xf32, #tpu.memory_space<vmem>>, %arg4: memref<1x36x128xbf16, #tpu.memory_space<vmem>>, %arg5: memref<1x32x128xf32, #tpu.memory_space<vmem>>) attributes {dimension_semantics = [#tpu.dimension_semantics<parallel>, #tpu.dimension_semantics<parallel>], iteration_bounds = array<i64: 2, 1>, scalar_prefetch = 0 : i64, scratch_operands = 0 : i64, tpu.core_type = #tpu.core_type<tc>, window_params = [{pipeline_mode = #tpu.pipeline_mode<synchronous>, transform_indices = @transform_0, window_bounds = array<i64: 32, 36>}, {pipeline_mode = #tpu.pipeline_mode<synchronous>, transform_indices = @transform_1, window_bounds = array<i64: 32, 1>}, {transform_indices = @transform_2, window_bounds = array<i64: 1, 36, 128>}, {transform_indices = @transform_3, window_bounds = array<i64: 1, 32, 128>}]} {
    %c0 = arith.constant 0 : index
    %c0_0 = arith.constant 0 : index
    %0 = vector.load %arg2[%c0, %c0_0] : memref<32x36xbf16, #tpu.memory_space<vmem>>, vector<32x36xbf16>
    %c0_1 = arith.constant 0 : index
    %c0_2 = arith.constant 0 : index
    %c0_3 = arith.constant 0 : index
    %1 = vector.load %arg4[%c0_1, %c0_2, %c0_3] : memref<1x36x128xbf16, #tpu.memory_space<vmem>>, vector<1x36x128xbf16>
    %2 = vector.shape_cast %1 : vector<1x36x128xbf16> to vector<36x128xbf16>
    %cst = arith.constant dense<0.000000e+00> : vector<32x128xf32>
    %3 = tpu.matmul %0, %2, %cst {dimension_numbers = #tpu.dot_dimension_numbers<[1], [0], [0], [1], [0, 0, 1, 1], [], []>} : vector<32x36xbf16>, vector<36x128xbf16>, vector<32x128xf32> -> vector<32x128xf32>
    %c0_4 = arith.constant 0 : index
    %c0_5 = arith.constant 0 : index
    %4 = vector.load %arg3[%c0_4, %c0_5] : memref<32x1xf32, #tpu.memory_space<vmem>>, vector<32x1xf32>
    %5 = vector.broadcast %4 : vector<32x1xf32> to vector<32x128xf32>
    %6 = arith.addf %3, %5 : vector<32x128xf32>
    %cst_6 = arith.constant 0.000000e+00 : f32
    %7 = vector.broadcast %cst_6 : f32 to vector<32x128xf32>
    %8 = arith.maximumf %6, %7 : vector<32x128xf32>
    %c0_7 = arith.constant 0 : index
    %c0_8 = arith.constant 0 : index
    %c0_9 = arith.constant 0 : index
    %9 = vector.load %arg5[%c0_7, %c0_8, %c0_9] : memref<1x32x128xf32, #tpu.memory_space<vmem>>, vector<1x32x128xf32>
    %10 = vector.shape_cast %9 : vector<1x32x128xf32> to vector<32x128xf32>
    %11 = vector.shape_cast %8 : vector<32x128xf32> to vector<1x32x128xf32>
    tpu.vector_store %arg5[%c0_7, %c0_8, %c0_9], %11 {strides = array<i32>} : memref<1x32x128xf32, #tpu.memory_space<vmem>>, vector<1x32x128xf32>,
    return
  }
  func.func @transform_0(%arg0: i32, %arg1: i32) -> (i32, i32) {
    %c0_i32 = arith.constant 0 : i32
    %c0_i32_0 = arith.constant 0 : i32
    %c0_i32_1 = arith.constant 0 : i32
    return %c0_i32, %c0_i32_0 : i32, i32
  }
  func.func @transform_1(%arg0: i32, %arg1: i32) -> (i32, i32) {
    %c0_i32 = arith.constant 0 : i32
    %c0_i32_0 = arith.constant 0 : i32
    %c0_i32_1 = arith.constant 0 : i32
    return %c0_i32, %c0_i32_0 : i32, i32
  }
  func.func @transform_2(%arg0: i32, %arg1: i32) -> (i32, i32, i32) {
    %c0_i32 = arith.constant 0 : i32
    %c0_i32_0 = arith.constant 0 : i32
    return %arg0, %c0_i32, %arg1 : i32, i32, i32
  }
  func.func @transform_3(%arg0: i32, %arg1: i32) -> (i32, i32, i32) {
    %c0_i32 = arith.constant 0 : i32
    %c0_i32_0 = arith.constant 0 : i32
    return %arg0, %c0_i32, %arg1 : i32, i32, i32
  }
}

</mosaic_0001>

<bundles_post_ra>
// kernel: tpu_custom_call.1
= control target key start
LH: loop header
LB: loop body
LE: loop exit
PB: predicated region body
PF: predicated region fallthrough
CT: control target
= control target key end

     0   :  { %8 = vsyncpa [#allocation3], 0  ;;  %s752_s0 = inlined_call_operand.vmem [shape: bf16[32,36], index: 0, kind: input, shape index: {}]   ;;  %s753_s1 = inlined_call_operand.vmem [shape: f32[32,1], index: 1, kind: input, shape index: {}]   ;;  %s754_s2 = inlined_call_operand.vmem [shape: bf16[2,36,128], index: 2, kind: input, shape index: {}]   ;;  %s755_s3 = inlined_call_operand.hbm [shape: f32[2,32,128], index: 3, kind: output, shape index: {}]  }
   0x1   :  { %10 = vsyncpa [#allocation3 + $0x1], 0  ;;  %s618_s12 = smov 0   ;;  %s620_s13 = smov 0  }
   0x2   :  { %s622_s14 = smov 0   ;;  %s624_s15 = smov 0  }
   0x3   :  { %s626_s16 = smov 0   ;;  %s628_s17 = smov 0  }
   0x4 LB: > { %s414_s18 = sadd.s32 4294967295, %s592_s17   ;;  %s415_s19 = sadd.s32 4294967294, %s592_s17   ;;  %s592_s17 = sphi %s628_s17, %s16_s17   ;;  %s588_s16 = sphi %s626_s16, %s762_s16   ;;  %s584_s15 = sphi %s624_s15, %s761_s15   ;;  %s580_s14 = sphi %s622_s14, %s760_s14   ;;  %s576_s13 = sphi %s620_s13, %s759_s13   ;;  %s572_s12 = sphi %s618_s12, %s758_s12  }
   0x5   : > { %s28_s20 = sadd.s32 1, %s588_s16  ;;  %s107_s21 = sadd.s32 1, %s580_s14 }
   0x6   : > { %p30_p0 = scmp.ge.s32.totalorder %s28_s20, 2  ;;  %p117_p1 = scmp.ne.s32.totalorder %s580_s14, %s576_s13 }
   0x7   : > { %p118_p2 = scmp.eq.s32.totalorder %s414_s18, 1  ;;  %p123_p3 = scmp.ne.s32.totalorder %s576_s13, %s572_s12 }
   0x8   : > { %s764_s20 = smov (%p30_p0, %s28_s20), 0  ;;  %p124_p5 = scmp.eq.s32.totalorder %s415_s19, 1 }
   0x9   : > { %p658_p4 = por %p118_p2, %p117_p1  ;;  %s102_s23 = ssub.s32 %s588_s16, %s764_s20 }
   0xa   : > { %p418_p6 = scmp.ge.s32.totalorder %s592_s17, 1  ;;  %p105_p7 = scmp.eq.s32.totalorder %s102_s23, 0 }
   0xb   : > { %p665_p8 = por %p124_p5, %p123_p3  ;;  %p159_p9 = scmp.lt.s32.totalorder %s592_s17, 3 }
   0xc   : > { %s671_s25 = scalar_select %p105_p7, %s580_s14, %s107_s21  }
   0xd   : > { %p160_p10 = pnand %p418_p6, %p159_p9 }
   0xe   : > { %p186_p11 = scmp.lt.s32.totalorder (!%p160_p10), %s584_s15, 1  ;;  %s183_s26 = sand.u32 (!%p160_p10), 1, %s576_s13  }
   0xf   : > { %163 = sbr.rel (%p160_p10) target bundleno = 255 (0xff), region = 32  ;;  %s419_s27 = sshll.u32 (!%p160_p10), %s183_s26, 5 }
  0x10   : > { %s433_s30 = sshll.u32 (!%p160_p10), %s584_s15, 9  ;;  %s707_s7 = scalar_lea.sflag (!%p160_p10), [#allocation3], %s183_s26 }
  0x11   : > { %s595_s8 = smov (!%p160_p10), [#allocation2]  }
  0x12   : > { %s520_s9 = sshll.u32 (!%p160_p10), %s595_s8, 4  ;;  %s521_s9 = int_to_ptr.vmem [resolvable:$false] %s520_s9 }
  0x13   : > { %s522_s10 = scalar_lea.vmem (!%p160_p10), %s521_s9, 1024 }
  0x14   : > { %v514_v0 = vld [vmem:[%s752_s0] sm:$0xff]   ;;  %vm253_vm0 = vcmask 293888   ;;  %s187_s28 = scalar_select %p186_p11, %s584_s15, 1  ;;  %v206_v1 = vld [vmem:[%s753_s1 + $0x10] sm:$0xff]  ;;  %v594_v3 = vmov 0   ;;  %v207_v4 = vld [vmem:[%s753_s1 + $0x18] sm:$0xff] }
  0x15   : > { %v204_v2 = vld [vmem:[%s753_s1] sm:$0xff]  ;;  %445 = vmatprep.mubr.msk.bf16.mxu0 %vm253_vm0, %v514_v0  ;;  %510 = vset.pattern.permute.xlu1 %v594_v3  ;;  %vm260_vm1 = vcmask 1041408   ;;  %v205_v5 = vld [vmem:[%s753_s1 + $0x8] sm:$0xff] }
  0x16   : > { %s450_s6 = smul.u32 20, %s187_s28  ;;  %509 = vset.pattern.permute.xlu0 %v594_v3  ;;  %220 = vperm.xlu1 %510, %v206_v1   ;;  %v515_v10 = vld [vmem:[%s752_s0 + $0x8] sm:$0xff]   ;;  %s185_s28 = scalar_lea.vmem [#allocation2], %s419_s27 }
  0x17   : > { %210 = vperm.xlu0 %509, %v204_v2   ;;  %s336_s29 = sshll.u32 %s185_s28, 4  ;;  %s700_s29 = int_to_ptr.vmem [resolvable:$true] %s336_s29 }
  0x18   : > { %s193_s11 = scalar_lea.vmem %s754_s2, %s450_s6  ;;  %s705_s6 = scalar_lea.hbm %s755_s3, %s433_s30 }
  0x19   : > { %v511_v6 = vld [vmem:[%s193_s11 + $0x10] ss:$0 sps:$4 sm:$0x33]   ;;  %v512_v7 = vld [vmem:[%s193_s11 + $0x8] sm:$0xff]   ;;  %v513_v9 = vld [vmem:[%s193_s11] sm:$0xff]   ;;  %s516_s15 = scalar_lea.vmem %s700_s29, 512  ;;  %p523_p1 = scmp.lt.s32.totalorder %s700_s29, %s521_s9 }
  0x1a   : > { %225 = vperm.xlu1 %510, %v207_v4   ;;  %449 = vmatprep.subr.msk.bf16.mxu0 %vm260_vm1, %v511_v6  ;;  %v262_v8 = vsel %vm260_vm1, %v511_v6, 0  ;;  %p517_p12 = scmp.ne.s32.totalorder %s700_s29, %s516_s15  ;;  %p524_p2 = scmp.lt.s32.totalorder %s522_s10, %s516_s15 }
  0x1b   : > { %215 = vperm.xlu0 %509, %v205_v5   ;;  %440 = vmatpush3.bf16.msra.mxu0 %v262_v8 }
  0x1c   : > { %441 = vmatprep.subr.bf16.mxu0 %v512_v7  ;;  %p518_p13 = pnand %p517_p12, %p658_p4  ;;  %p525_p3 = por %p524_p2, %p523_p1 }
  0x1e   : > { %p519_p0 = pneg %p518_p13 }
  0x1f   : > { %442 = vmatpush3.bf16.msra.mxu0 %v512_v7 }
  0x20   : > { %443 = vmatprep.subr.bf16.mxu0 %v513_v9  ;;  %p526_p5 = pnand %p525_p3, %p519_p0 }
  0x23   : > { %444 = vmatpush3.bf16.msra.mxu0 %v513_v9 }
  0x26   : > { %446 = vmatmul.mubr.msk.bf16.vlgmr.msra.gmra.mxu0 %vm253_vm0, %v515_v10 }
  0x91   : > { %v221_v11 = vpop.permute.xlu1 %220 }
  0x92   : > { %v211_v12 = vpop.permute.xlu0 %210 }
  0x95   : > { %v226_v18 = vpop.permute.xlu1 %225 }
  0x96   : > { %v216_v22 = vpop.permute.xlu0 %215 }
  0xe6   : > { %v447_v13 = vpop.f32.mrf.mxu0 }
  0xe7   : > { %v307_v14 = vadd.f32 %v447_v13, %v221_v11 }
  0xe8   : > { %v298_v15 = vpop.f32.mrf.mxu0 }
  0xe9   : > { %v315_v16 = vmax.f32 %v307_v14, 0.0  ;;  %v299_v17 = vadd.f32 %v298_v15, %v211_v12 }
  0xea   : > { %v448_v19 = vpop.f32.mrf.mxu0 }
  0xeb   : > { %319 = vst [vmem:[%s185_s28 + $0x10] sm:$0xff] %v315_v16  ;;  %v313_v20 = vmax.f32 %v299_v17, 0.0  ;;  %v310_v21 = vadd.f32 %v448_v19, %v226_v18 }
  0xec   : > { %v301_v23 = vpop.f32.mrf.mxu0 }
  0xed   : > { %317 = vst [vmem:[%s185_s28] sm:$0xff] %v313_v20  ;;  %v316_v24 = vmax.f32 %v310_v21, 0.0  ;;  %v302_v25 = vadd.f32 %v301_v23, %v216_v22 }
  0xef   : > { %320 = vst [vmem:[%s185_s28 + $0x18] sm:$0xff] %v316_v24  ;;  %v314_v26 = vmax.f32 %v302_v25, 0.0 }
  0xf1   : > { %318 = vst [vmem:[%s185_s28 + $0x8] sm:$0xff] %v314_v26 }
  0xf2   : > { %529 = shalt.err (!%p526_p5)
}
  0xf3   : > { %s530_s11 = scalar_lea.hbm %s705_s6, 512  ;;  %s534_s21 = scalar_lea.hbm %s755_s3, 1024 }
  0xf4   : > { %p531_p6 = scmp.ne.s32.totalorder %s705_s6, %s530_s11  ;;  %p535_p10 = scmp.lt.s32.totalorder %s705_s6, %s755_s3 }
  0xf5   : > { %p536_p11 = scmp.lt.s32.totalorder %s534_s21, %s530_s11 }
  0xf6   : > { %p532_p7 = pnand %p531_p6, %p658_p4 }
  0xf7   : > { %p537_p12 = por %p536_p11, %p535_p10 }
  0xf8   : > { %p533_p9 = pneg %p532_p7 }
  0xfa   : > { %p538_p13 = pnand %p537_p12, %p533_p9 }
  0xfc   : > { %541 = shalt.err (!%p538_p13)
}
  0xfd   : > { %s596_s27 = smov 128   ;;  %s597_s28 = smov 8  }
  0xfe   : > { %451 = dma.vmem_to_hbm [thread:$0]  (%p658_p4), %s700_s29, 512, %s705_s6, %s707_s7, %s596_s27, %s596_s27, %s597_s28  }
  0xff PF: > { %p457_p0 = scmp.ge.s32.totalorder %s592_s17, 2  ;;  %s351_s30 = sand.u32 1, %s572_s12  }
 0x100   : > { %s352_s4 = scalar_lea.sflag [#allocation3], %s351_s30 }
 0x101   : > { %p454_p1 = pnand %p457_p0, %p665_p8 }
 0x103   : > { %p455_p2 = pneg %p454_p1 }
 0x105   : > { %567 = dma.done.wait (%p455_p2), %s352_s4, 512  }
 0x106   : > { %569 = vsyncadd (%p455_p2), %s352_s4, 4294966784  ;;  %s16_s17 = sadd.s32 1, %s592_s17   ;;  %s758_s12 = smov %s576_s13 }
 0x107   : > { %p13_p3 = scmp.ge.s32.totalorder %s16_s17, 4   ;;  %s759_s13 = smov %s580_s14 }
 0x108   : > { %s760_s14 = smov %s671_s25  ;;  %s761_s15 = smov %s588_s16 }
 0x109   : > { %s762_s16 = smov %s764_s20  ;;  %15 = sbr.rel (!%p13_p3) target bundleno = 4 (0x4), region = 67 }
 0x10e   :  { %357 = vsyncpa [#allocation3], 1 }
 0x10f   :  { %359 = vsyncpa [#allocation3 + $0x1], 1 }

</bundles_post_ra>
